<compile_context>
chip_gen: v6e
topology: v6e:2x2x1
jax: 0.10.0
libtpu: 0.0.40
codegen_flags: <defaults>
</compile_context>

<pallas_src>
import functools

import jax
import jax.numpy as jnp
from jax import lax
from jax.experimental import pallas as pl
from jax.experimental.pallas import tpu as pltpu

BN_EPS = 1e-5


def _footballnet_kernel(
    x_ref,                       # (F, tn)  compute dtype, batch on lanes
    w1_ref, b1_ref,              # (2H, F), (2H, 1)
    w2_ref, b2_ref,              # (H, 2H), (H, 1)   BN1 folded in
    w3_ref, b3_ref,              # (H//2, H), (H//2, 1)  BN2 folded in
    w4_ref, b4_ref,              # (2, H//2), (2, 1)
    out_ref,                     # (2, tn)  f32
):
    """Fused MLP forward for one batch tile (batch on the lane axis)."""
    x = x_ref[...]

    # Layer 1: Linear -> ReLU        (f32 accumulation, f32 bias/ReLU)
    h = jnp.dot(w1_ref[...], x, preferred_element_type=jnp.float32) + b1_ref[...]
    h = jnp.maximum(h, 0.0)

    # Layer 2: (BN1 folded) Linear -> ReLU
    w2 = w2_ref[...]
    h = jnp.dot(w2, h.astype(w2.dtype), preferred_element_type=jnp.float32) + b2_ref[...]
    h = jnp.maximum(h, 0.0)

    # Layer 3: (BN2 folded) Linear -> ReLU
    w3 = w3_ref[...]
    h = jnp.dot(w3, h.astype(w3.dtype), preferred_element_type=jnp.float32) + b3_ref[...]
    h = jnp.maximum(h, 0.0)

    # Layer 4: Linear (logits, 2 rows x tn lanes -> lane-dense unmasked store)
    w4 = w4_ref[...]
    out_ref[...] = (
        jnp.dot(w4, h.astype(w4.dtype), preferred_element_type=jnp.float32) + b4_ref[...]
    ).astype(out_ref.dtype)


def init_params(key, input_size, hidden_size):
    """Deterministic params mirroring the PyTorch module (weights are (out, in))."""
    h2, h1, hh = hidden_size * 2, hidden_size, hidden_size // 2
    dims = [(input_size, h2), (h2, h1), (h1, hh), (hh, 2)]
    keys = iter(jax.random.split(key, 24))
    params = {}
    for i, (fan_in, fan_out) in enumerate(dims, start=1):
        bound = 1.0 / float(fan_in) ** 0.5
        params[f"w{i}"] = jax.random.uniform(
            next(keys), (fan_out, fan_in), jnp.float32, -bound, bound)
        params[f"b{i}"] = jax.random.uniform(
            next(keys), (fan_out,), jnp.float32, -bound, bound)
    # BatchNorm1d params (affine + running stats), eval-mode usage.
    for i, c in ((1, h2), (2, h1)):
        params[f"g{i}"] = 1.0 + 0.1 * jax.random.normal(next(keys), (c,), jnp.float32)
        params[f"be{i}"] = 0.1 * jax.random.normal(next(keys), (c,), jnp.float32)
        params[f"rm{i}"] = 0.05 * jax.random.normal(next(keys), (c,), jnp.float32)
        params[f"rv{i}"] = 1.0 + 0.1 * jax.random.uniform(next(keys), (c,), jnp.float32)
    return params


def prepare_params(params, compute_dtype=jnp.bfloat16):
    """One-time prep (hoisted out of the forward): fold eval-mode BatchNorms
    into the *following* Linear (exact in eval mode), cast weights to the MXU
    compute dtype, and reshape biases to (out, 1) f32 for the transposed layout.

      BN(h) = s*h + t ;  W @ (s*h + t) + b = (W * s[None,:]) @ h + (W @ t + b)
    """
    s1 = params["g1"] * lax.rsqrt(params["rv1"] + BN_EPS)       # (2H,)
    t1 = params["be1"] - params["rm1"] * s1
    s2 = params["g2"] * lax.rsqrt(params["rv2"] + BN_EPS)       # (H,)
    t2 = params["be2"] - params["rm2"] * s2

    w1, b1 = params["w1"], params["b1"]
    w2 = params["w2"] * s1[None, :]
    b2 = params["b2"] + params["w2"] @ t1
    w3 = params["w3"] * s2[None, :]
    b3 = params["b3"] + params["w3"] @ t2
    w4, b4 = params["w4"], params["b4"]

    prep = {}
    for i, (w, b) in enumerate(((w1, b1), (w2, b2), (w3, b3), (w4, b4)), start=1):
        prep[f"w{i}"] = w.astype(compute_dtype)
        prep[f"b{i}"] = jnp.asarray(b, jnp.float32).reshape(-1, 1)
    return prep


def _round_up(a, b):
    return (a + b - 1) // b * b


@functools.partial(jax.jit, static_argnames=("tile_n",))
def footballnet_forward(x, prep, *, tile_n=4096):
    """Fused FootballNet forward.  x: (N, F) f32; prep: prepare_params(...).
    Returns (N, 2) f32 logits."""
    assert tile_n % 128 == 0, "tile_n must be lane-aligned (multiple of 128)"
    N, F = x.shape

    w1, b1 = prep["w1"], prep["b1"]
    w2, b2 = prep["w2"], prep["b2"]
    w3, b3 = prep["w3"], prep["b3"]
    w4, b4 = prep["w4"], prep["b4"]
    cdt = w1.dtype

    # Batch-on-lanes layout: transpose so batch is the (fast) lane axis.
    xT = x.astype(cdt).T                                         # (F, N)

    # Pad batch to a lane-aligned multiple of the tile.
    Np = _round_up(max(N, 128), 128)
    tn = min(tile_n, Np)
    # v7x megacore: keep >= 2 "parallel" grid steps when the batch allows it.
    if tn == Np and Np >= 256 and (Np // 128) % 2 == 0:
        tn = Np // 2
    Np = _round_up(Np, tn)
    if Np != N:
        xT = jnp.pad(xT, ((0, 0), (0, Np - N)))
    grid = (Np // tn,)

    ordered = [w1, b1, w2, b2, w3, b3, w4, b4]
    full = lambda a: pl.BlockSpec(a.shape, lambda i: (0, 0))     # constant block

    H2, H1, HH, O = w1.shape[0], w2.shape[0], w3.shape[0], w4.shape[0]
    flops = 2 * Np * (F * H2 + H2 * H1 + H1 * HH + HH * O)
    bytes_accessed = (
        xT.size * xT.dtype.itemsize
        + sum(a.size * a.dtype.itemsize for a in ordered)
        + Np * O * 4
    )

    out = pl.pallas_call(
        _footballnet_kernel,
        out_shape=jax.ShapeDtypeStruct((O, Np), jnp.float32),
        grid_spec=pltpu.PrefetchScalarGridSpec(
            num_scalar_prefetch=0,
            grid=grid,
            in_specs=[pl.BlockSpec((F, tn), lambda i: (0, i))]
                     + [full(a) for a in ordered],
            out_specs=pl.BlockSpec((O, tn), lambda i: (0, i)),
        ),
        compiler_params=pltpu.CompilerParams(
            dimension_semantics=("parallel",)),
        cost_estimate=pl.CostEstimate(
            flops=int(flops), transcendentals=0, bytes_accessed=int(bytes_accessed)),
    )(xT, *ordered)

    return out[:, :N].T                                          # (N, 2)


def reference_forward(x, params):
    """Plain-JAX reference (eval-mode PyTorch semantics) for validation."""
    h = jnp.maximum(x @ params["w1"].T + params["b1"], 0.0)
    h = (h - params["rm1"]) * lax.rsqrt(params["rv1"] + BN_EPS) * params["g1"] + params["be1"]
    h = jnp.maximum(h @ params["w2"].T + params["b2"], 0.0)
    h = (h - params["rm2"]) * lax.rsqrt(params["rv2"] + BN_EPS) * params["g2"] + params["be2"]
    h = jnp.maximum(h @ params["w3"].T + params["b3"], 0.0)
    return h @ params["w4"].T + params["b4"]


if __name__ == "__main__":
    INPUT_SIZE = 16
    HIDDEN = 32      # -> layer widths 64, 32, 16, 2
    BATCH = 16

    key = jax.random.PRNGKey(0)
    k_params, k_x, k_big = jax.random.split(key, 3)
    params = init_params(k_params, INPUT_SIZE, HIDDEN)
    x = jax.random.normal(k_x, (BATCH, INPUT_SIZE), jnp.float32)
    ref = reference_forward(x, params)

    # f32 MXU operands: strict check vs. the unfolded reference.
    prep_f32 = prepare_params(params, compute_dtype=jnp.float32)
    out = jax.block_until_ready(footballnet_forward(x, prep_f32))
    assert out.shape == (BATCH, 2)
    assert jnp.allclose(out, ref, atol=1e-3, rtol=1e-3), "f32 mismatch vs reference"

    # Ragged batch (exercises zero-padding of the lane/batch axis).
    out_r = jax.block_until_ready(footballnet_forward(x[:10], prep_f32))
    assert out_r.shape == (10, 2)
    assert jnp.allclose(out_r, ref[:10], atol=1e-3, rtol=1e-3), "ragged-batch mismatch"

    # Default bf16 MXU operands (fast path on v5e/v6e/v7x): loose tolerance vs
    # the f32 reference; real folding/layout bugs produce errors >> 5e-2.
    prep_bf16 = prepare_params(params)   # compute_dtype=jnp.bfloat16
    out_bf16 = jax.block_until_ready(footballnet_forward(x, prep_bf16))
    assert out_bf16.shape == (BATCH, 2)
    assert jnp.allclose(out_bf16, ref, atol=5e-2, rtol=5e-2), "bf16 mismatch vs reference"

    # Larger batch -> multi-step "parallel" grid (megacore path on v7x).
    x_big = jax.random.normal(k_big, (512, INPUT_SIZE), jnp.float32)
    ref_big = reference_forward(x_big, params)
    out_big_f32 = jax.block_until_ready(footballnet_forward(x_big, prep_f32))
    assert out_big_f32.shape == (512, 2)
    assert jnp.allclose(out_big_f32, ref_big, atol=1e-3, rtol=1e-3), "multi-tile f32 mismatch"
    out_big_bf16 = jax.block_until_ready(footballnet_forward(x_big, prep_bf16))
    assert jnp.allclose(out_big_bf16, ref_big, atol=5e-2, rtol=5e-2), "multi-tile bf16 mismatch"

    print("KERNEL_OK")
</pallas_src>

<mosaic_0001>
module attributes {stable_mosaic.version = 11 : i64} {
  func.func @_footballnet_kernel(%arg0: i32, %arg1: memref<16x128xf32, #tpu.memory_space<vmem>>, %arg2: memref<64x16xf32, #tpu.memory_space<vmem>>, %arg3: memref<64x1xf32, #tpu.memory_space<vmem>>, %arg4: memref<32x64xf32, #tpu.memory_space<vmem>>, %arg5: memref<32x1xf32, #tpu.memory_space<vmem>>, %arg6: memref<16x32xf32, #tpu.memory_space<vmem>>, %arg7: memref<16x1xf32, #tpu.memory_space<vmem>>, %arg8: memref<2x16xf32, #tpu.memory_space<vmem>>, %arg9: memref<2x1xf32, #tpu.memory_space<vmem>>, %arg10: memref<2x128xf32, #tpu.memory_space<vmem>>) attributes {dimension_semantics = [#tpu.dimension_semantics<parallel>], iteration_bounds = array<i64: 1>, scalar_prefetch = 0 : i64, scratch_operands = 0 : i64, tpu.core_type = #tpu.core_type<tc>, window_params = [{transform_indices = @transform_0, window_bounds = array<i64: 16, 128>}, {pipeline_mode = #tpu.pipeline_mode<synchronous>, transform_indices = @transform_1, window_bounds = array<i64: 64, 16>}, {pipeline_mode = #tpu.pipeline_mode<synchronous>, transform_indices = @transform_2, window_bounds = array<i64: 64, 1>}, {pipeline_mode = #tpu.pipeline_mode<synchronous>, transform_indices = @transform_3, window_bounds = array<i64: 32, 64>}, {pipeline_mode = #tpu.pipeline_mode<synchronous>, transform_indices = @transform_4, window_bounds = array<i64: 32, 1>}, {pipeline_mode = #tpu.pipeline_mode<synchronous>, transform_indices = @transform_5, window_bounds = array<i64: 16, 32>}, {pipeline_mode = #tpu.pipeline_mode<synchronous>, transform_indices = @transform_6, window_bounds = array<i64: 16, 1>}, {pipeline_mode = #tpu.pipeline_mode<synchronous>, transform_indices = @transform_7, window_bounds = array<i64: 2, 16>}, {pipeline_mode = #tpu.pipeline_mode<synchronous>, transform_indices = @transform_8, window_bounds = array<i64: 2, 1>}, {transform_indices = @transform_9, window_bounds = array<i64: 2, 128>}]} {
    %c0 = arith.constant 0 : index
    %c0_0 = arith.constant 0 : index
    %0 = vector.load %arg1[%c0, %c0_0] : memref<16x128xf32, #tpu.memory_space<vmem>>, vector<16x128xf32>
    %c0_1 = arith.constant 0 : index
    %c0_2 = arith.constant 0 : index
    %1 = vector.load %arg2[%c0_1, %c0_2] : memref<64x16xf32, #tpu.memory_space<vmem>>, vector<64x16xf32>
    %cst = arith.constant dense<0.000000e+00> : vector<64x128xf32>
    %2 = tpu.matmul %1, %0, %cst {dimension_numbers = #tpu.dot_dimension_numbers<[1], [0], [0], [1], [0, 0, 1, 1], [], []>} : vector<64x16xf32>, vector<16x128xf32>, vector<64x128xf32> -> vector<64x128xf32>
    %c0_3 = arith.constant 0 : index
    %c0_4 = arith.constant 0 : index
    %3 = vector.load %arg3[%c0_3, %c0_4] : memref<64x1xf32, #tpu.memory_space<vmem>>, vector<64x1xf32>
    %4 = vector.broadcast %3 : vector<64x1xf32> to vector<64x128xf32>
    %5 = arith.addf %2, %4 : vector<64x128xf32>
    %cst_5 = arith.constant 0.000000e+00 : f32
    %6 = vector.broadcast %cst_5 : f32 to vector<64x128xf32>
    %7 = arith.maximumf %5, %6 : vector<64x128xf32>
    %c0_6 = arith.constant 0 : index
    %c0_7 = arith.constant 0 : index
    %8 = vector.load %arg4[%c0_6, %c0_7] : memref<32x64xf32, #tpu.memory_space<vmem>>, vector<32x64xf32>
    %cst_8 = arith.constant dense<0.000000e+00> : vector<32x128xf32>
    %9 = tpu.matmul %8, %7, %cst_8 {dimension_numbers = #tpu.dot_dimension_numbers<[1], [0], [0], [1], [0, 0, 1, 1], [], []>} : vector<32x64xf32>, vector<64x128xf32>, vector<32x128xf32> -> vector<32x128xf32>
    %c0_9 = arith.constant 0 : index
    %c0_10 = arith.constant 0 : index
    %10 = vector.load %arg5[%c0_9, %c0_10] : memref<32x1xf32, #tpu.memory_space<vmem>>, vector<32x1xf32>
    %11 = vector.broadcast %10 : vector<32x1xf32> to vector<32x128xf32>
    %12 = arith.addf %9, %11 : vector<32x128xf32>
    %cst_11 = arith.constant 0.000000e+00 : f32
    %13 = vector.broadcast %cst_11 : f32 to vector<32x128xf32>
    %14 = arith.maximumf %12, %13 : vector<32x128xf32>
    %c0_12 = arith.constant 0 : index
    %c0_13 = arith.constant 0 : index
    %15 = vector.load %arg6[%c0_12, %c0_13] : memref<16x32xf32, #tpu.memory_space<vmem>>, vector<16x32xf32>
    %cst_14 = arith.constant dense<0.000000e+00> : vector<16x128xf32>
    %16 = tpu.matmul %15, %14, %cst_14 {dimension_numbers = #tpu.dot_dimension_numbers<[1], [0], [0], [1], [0, 0, 1, 1], [], []>} : vector<16x32xf32>, vector<32x128xf32>, vector<16x128xf32> -> vector<16x128xf32>
    %c0_15 = arith.constant 0 : index
    %c0_16 = arith.constant 0 : index
    %17 = vector.load %arg7[%c0_15, %c0_16] : memref<16x1xf32, #tpu.memory_space<vmem>>, vector<16x1xf32>
    %18 = vector.broadcast %17 : vector<16x1xf32> to vector<16x128xf32>
    %19 = arith.addf %16, %18 : vector<16x128xf32>
    %cst_17 = arith.constant 0.000000e+00 : f32
    %20 = vector.broadcast %cst_17 : f32 to vector<16x128xf32>
    %21 = arith.maximumf %19, %20 : vector<16x128xf32>
    %c0_18 = arith.constant 0 : index
    %c0_19 = arith.constant 0 : index
    %22 = vector.load %arg8[%c0_18, %c0_19] : memref<2x16xf32, #tpu.memory_space<vmem>>, vector<2x16xf32>
    %cst_20 = arith.constant dense<0.000000e+00> : vector<2x128xf32>
    %23 = tpu.matmul %22, %21, %cst_20 {dimension_numbers = #tpu.dot_dimension_numbers<[1], [0], [0], [1], [0, 0, 1, 1], [], []>} : vector<2x16xf32>, vector<16x128xf32>, vector<2x128xf32> -> vector<2x128xf32>
    %c0_21 = arith.constant 0 : index
    %c0_22 = arith.constant 0 : index
    %24 = vector.load %arg9[%c0_21, %c0_22] : memref<2x1xf32, #tpu.memory_space<vmem>>, vector<2x1xf32>
    %25 = vector.broadcast %24 : vector<2x1xf32> to vector<2x128xf32>
    %26 = arith.addf %23, %25 : vector<2x128xf32>
    %c0_23 = arith.constant 0 : index
    %c0_24 = arith.constant 0 : index
    %27 = vector.load %arg10[%c0_23, %c0_24] : memref<2x128xf32, #tpu.memory_space<vmem>>, vector<2x128xf32>
    tpu.vector_store %arg10[%c0_23, %c0_24], %26 {strides = array<i32>} : memref<2x128xf32, #tpu.memory_space<vmem>>, vector<2x128xf32>,
    return
  }
  func.func @transform_0(%arg0: i32) -> (i32, i32) {
    %c0_i32 = arith.constant 0 : i32
    %c0_i32_0 = arith.constant 0 : i32
    return %c0_i32, %arg0 : i32, i32
  }
  func.func @transform_1(%arg0: i32) -> (i32, i32) {
    %c0_i32 = arith.constant 0 : i32
    %c0_i32_0 = arith.constant 0 : i32
    %c0_i32_1 = arith.constant 0 : i32
    return %c0_i32, %c0_i32_0 : i32, i32
  }
  func.func @transform_2(%arg0: i32) -> (i32, i32) {
    %c0_i32 = arith.constant 0 : i32
    %c0_i32_0 = arith.constant 0 : i32
    %c0_i32_1 = arith.constant 0 : i32
    return %c0_i32, %c0_i32_0 : i32, i32
  }
  func.func @transform_3(%arg0: i32) -> (i32, i32) {
    %c0_i32 = arith.constant 0 : i32
    %c0_i32_0 = arith.constant 0 : i32
    %c0_i32_1 = arith.constant 0 : i32
    return %c0_i32, %c0_i32_0 : i32, i32
  }
  func.func @transform_4(%arg0: i32) -> (i32, i32) {
    %c0_i32 = arith.constant 0 : i32
    %c0_i32_0 = arith.constant 0 : i32
    %c0_i32_1 = arith.constant 0 : i32
    return %c0_i32, %c0_i32_0 : i32, i32
  }
  func.func @transform_5(%arg0: i32) -> (i32, i32) {
    %c0_i32 = arith.constant 0 : i32
    %c0_i32_0 = arith.constant 0 : i32
    %c0_i32_1 = arith.constant 0 : i32
    return %c0_i32, %c0_i32_0 : i32, i32
  }
  func.func @transform_6(%arg0: i32) -> (i32, i32) {
    %c0_i32 = arith.constant 0 : i32
    %c0_i32_0 = arith.constant 0 : i32
    %c0_i32_1 = arith.constant 0 : i32
    return %c0_i32, %c0_i32_0 : i32, i32
  }
  func.func @transform_7(%arg0: i32) -> (i32, i32) {
    %c0_i32 = arith.constant 0 : i32
    %c0_i32_0 = arith.constant 0 : i32
    %c0_i32_1 = arith.constant 0 : i32
    return %c0_i32, %c0_i32_0 : i32, i32
  }
  func.func @transform_8(%arg0: i32) -> (i32, i32) {
    %c0_i32 = arith.constant 0 : i32
    %c0_i32_0 = arith.constant 0 : i32
    %c0_i32_1 = arith.constant 0 : i32
    return %c0_i32, %c0_i32_0 : i32, i32
  }
  func.func @transform_9(%arg0: i32) -> (i32, i32) {
    %c0_i32 = arith.constant 0 : i32
    %c0_i32_0 = arith.constant 0 : i32
    return %c0_i32, %arg0 : i32, i32
  }
}

</mosaic_0001>

<bundles_post_ra>
// kernel: footballnet_forward.1
= control target key start
LH: loop header
LB: loop body
LE: loop exit
PB: predicated region body
PF: predicated region fallthrough
CT: control target
= control target key end

     0   :  { %vm90_vm0 = vcmask 130048   ;;  %v648_v3 = vmov 0   ;;  %vm256_vm1 = vcmask 523264   ;;  %vm372_vm2 = vcmask 261120   ;;  %s815_s0 = inlined_call_operand.vmem [shape: f32[16,128], index: 0, kind: input, shape index: {}]   ;;  %s816_s1 = inlined_call_operand.vmem [shape: f32[64,16], index: 1, kind: input, shape index: {}]   ;;  %s817_s2 = inlined_call_operand.vmem [shape: f32[64,1], index: 2, kind: input, shape index: {}]   ;;  %s818_s4 = inlined_call_operand.vmem [shape: f32[32,1], index: 4, kind: input, shape index: {}]   ;;  %s819_s6 = inlined_call_operand.vmem [shape: f32[16,1], index: 6, kind: input, shape index: {}]   ;;  %s820_s8 = inlined_call_operand.vmem [shape: f32[2,1], index: 8, kind: input, shape index: {}]   ;;  %s821_s3 = inlined_call_operand.vmem [shape: f32[32,64], index: 3, kind: input, shape index: {}]   ;;  %s822_s5 = inlined_call_operand.vmem [shape: f32[16,32], index: 5, kind: input, shape index: {}]   ;;  %s823_s7 = inlined_call_operand.vmem [shape: f32[2,16], index: 7, kind: input, shape index: {}]   ;;  %s824_s9 = inlined_call_operand.vmem [shape: f32[2,128], index: 9, kind: output, shape index: {}]  }
   0x1   :  { %v33_v0 = vld [vmem:[%s815_s0 + $0x8] sm:$0xff]  ;;  %v32_v1 = vld [vmem:[%s815_s0] sm:$0xff]  ;;  %646 = vset.pattern.permute.xlu0 %v648_v3  ;;  %647 = vset.pattern.permute.xlu1 %v648_v3  ;;  %v36_v5 = vld [vmem:[%s816_s1 + $0x10] sm:$0xff]  ;;  %vm650_vm3 = vmmov 0  }
   0x2   :  { %v34_v2 = vld [vmem:[%s816_s1] sm:$0xff]  ;;  %587 = vmatprep.subr.mxu0 %v33_v0  ;;  %v35_v4 = vld [vmem:[%s816_s1 + $0x8] sm:$0xff]  ;;  %v49_v6 = vld [vmem:[%s817_s2 + $0x38] sm:$0xff] }
   0x3   :  { %591 = vmatprep.mubr.msk.f32.mxu0 %vm90_vm0, %v34_v2  ;;  %588 = vmatpush3.msra.mxu0 %v33_v0  ;;  %v47_v7 = vld [vmem:[%s817_s2 + $0x28] sm:$0xff]  ;;  %v48_v8 = vld [vmem:[%s817_s2 + $0x30] sm:$0xff]  ;;  %v37_v9 = vld [vmem:[%s816_s1 + $0x18] sm:$0xff] }
   0x4   :  { %589 = vmatprep.subr.mxu0 %v32_v1  ;;  %87 = vperm.xlu0 %646, %v49_v6   ;;  %v46_v10 = vld [vmem:[%s817_s2 + $0x20] sm:$0xff]  ;;  %v45_v12 = vld [vmem:[%s817_s2 + $0x18] sm:$0xff]  ;;  %v39_v13 = vld [vmem:[%s816_s1 + $0x28] sm:$0xff] }
   0x5   :  { %590 = vmatpush3.msra.mxu0 %v32_v1  ;;  %77 = vperm.xlu1 %647, %v47_v7   ;;  %v38_v11 = vld [vmem:[%s816_s1 + $0x20] sm:$0xff]  ;;  %v44_v14 = vld [vmem:[%s817_s2 + $0x10] sm:$0xff]  ;;  %v43_v16 = vld [vmem:[%s817_s2 + $0x8] sm:$0xff] }
   0x6   :  { %592 = vmatmul.mubr.msk.f32.vlgmr.msra.gmra.mxu0 %vm90_vm0, %v35_v4  ;;  %v40_v15 = vld [vmem:[%s816_s1 + $0x30] sm:$0xff]  ;;  %v41_v17 = vld [vmem:[%s816_s1 + $0x38] sm:$0xff]  ;;  %v42_v18 = vld [vmem:[%s817_s2] sm:$0xff] }
   0x7   :  { %594 = vmatprep.mubr.msk.f32.mxu0 %vm90_vm0, %v36_v5  ;;  %v235_v19 = vld [vmem:[%s818_s4 + $0x18] sm:$0xff]  ;;  %v234_v20 = vld [vmem:[%s818_s4 + $0x10] sm:$0xff]  ;;  %v233_v21 = vld [vmem:[%s818_s4 + $0x8] sm:$0xff] }
   0x8   :  { %82 = vperm.xlu0 %646, %v48_v8   ;;  %v232_v22 = vld [vmem:[%s818_s4] sm:$0xff]  ;;  %v361_v23 = vld [vmem:[%s819_s6 + $0x8] sm:$0xff]  ;;  %v230_v60 = vld [vmem:[%s821_s3 + $0x10] sm:$0xff] }
   0x9   :  { %72 = vperm.xlu1 %647, %v46_v10   ;;  %v360_v24 = vld [vmem:[%s819_s6] sm:$0xff]  ;;  %v229_v59 = vld [vmem:[%s821_s3 + $0x8] sm:$0xff]  ;;  %v231_v61 = vld [vmem:[%s821_s3 + $0x18] sm:$0xff] }
   0xa   :  { %595 = vmatmul.mubr.msk.f32.gmra.mxu0 %vm90_vm0, %v37_v9  ;;  %v457_v25 = vld [vmem:[%s820_s8] sm:$0x3] }
   0xb   :  { %597 = vmatprep.mubr.msk.f32.mxu0 %vm90_vm0, %v38_v11  ;;  %v228_v26 = vld [vmem:[%s821_s3] sm:$0xff] }
   0xc   :  { %67 = vperm.xlu0 %646, %v45_v12   ;;  %619 = vmatprep.mubr.msk.f32.mxu1 %vm256_vm1, %v228_v26  ;;  %v358_v62 = vld [vmem:[%s822_s5] sm:$0xff] }
   0xd   :  { %62 = vperm.xlu1 %647, %v44_v14  }
   0xe   :  { %598 = vmatmul.mubr.msk.f32.gmra.mxu0 %vm90_vm0, %v39_v13 }
   0xf   :  { %600 = vmatprep.mubr.msk.f32.mxu0 %vm90_vm0, %v40_v15  ;;  %v359_v15 = vld [vmem:[%s822_s5 + $0x8] sm:$0xff] }
  0x10   :  { %57 = vperm.xlu0 %646, %v43_v16   ;;  %v649_v16 = vmov 0.0  }
  0x11   :  { %52 = vperm.xlu1 %647, %v42_v18  }
  0x12   :  { %601 = vmatmul.mubr.msk.f32.gmra.mxu0 %vm90_vm0, %v41_v17 }
  0x13   :  { %633 = vmatprep.mubr.msk.f32.mxu0 %vm372_vm2, %v358_v62 }
  0x14   :  { %253 = vperm.xlu0 %646, %v235_v19  }
  0x15   :  { %248 = vperm.xlu1 %647, %v234_v20  }
  0x18   :  { %243 = vperm.xlu0 %646, %v233_v21  }
  0x19   :  { %238 = vperm.xlu1 %647, %v232_v22  }
  0x1c   :  { %369 = vperm.xlu0 %646, %v361_v23  }
  0x1d   :  { %364 = vperm.xlu1 %647, %v360_v24  }
  0x20   :  { %460 = vperm.xlu0 %646, %v457_v25   ;;  %v456_v25 = vld [vmem:[%s823_s7] sm:$0x3] }
  0x7f   :  { %v88_v29 = vpop.permute.xlu0 %87 }
  0x80   :  { %v78_v30 = vpop.permute.xlu1 %77 }
  0x83   :  { %v83_v34 = vpop.permute.xlu0 %82 }
  0x84   :  { %v73_v35 = vpop.permute.xlu1 %72 }
  0x87   :  { %v68_v43 = vpop.permute.xlu0 %67 }
  0x88   :  { %v63_v44 = vpop.permute.xlu1 %62 }
  0x8b   :  { %v58_v51 = vpop.permute.xlu0 %57 }
  0x8c   :  { %v53_v52 = vpop.permute.xlu1 %52 }
  0x8f   :  { %v254_v63 = vpop.permute.xlu0 %253 }
  0x90   :  { %v249_v1 = vpop.permute.xlu1 %248 }
  0x93   :  { %v244_v5 = vpop.permute.xlu0 %243 }
  0x94   :  { %v239_v10 = vpop.permute.xlu1 %238 }
  0x97   :  { %v370_v17 = vpop.permute.xlu0 %369 }
  0x98   :  { %v365_v20 = vpop.permute.xlu1 %364 }
  0x9b   :  { %v461_v26 = vpop.permute.xlu0 %460 }
  0xc6   :  { %v593_v27 = vpop.f32.mrf.mxu0 }
  0xc7   :  { %v187_v53 = vadd.f32 %v593_v27, %v58_v51 }
  0xc8   :  { %v181_v28 = vpop.f32.mrf.mxu0 }
  0xc9   :  { %v182_v55 = vadd.f32 %v181_v28, %v53_v52  ;;  %v221_v57 = vmax.f32 %v187_v53, 0.0 }
  0xca   :  { %v596_v31 = vpop.f32.mrf.mxu0 }
  0xcb   :  { %v197_v47 = vadd.f32 %v596_v31, %v68_v43  ;;  %v220_v58 = vmax.f32 %v182_v55, 0.0 }
  0xcc   :  { %v191_v32 = vpop.f32.mrf.mxu0 }
  0xcd   :  { %v192_v49 = vadd.f32 %v191_v32, %v63_v44  ;;  %v223_v54 = vmax.f32 %v197_v47, 0.0 }
  0xce   :  { %v599_v33 = vpop.f32.mrf.mxu0 }
  0xcf   :  { %v207_v40 = vadd.f32 %v599_v33, %v78_v30  ;;  %v222_v56 = vmax.f32 %v192_v49, 0.0 }
  0xd0   :  { %v201_v36 = vpop.f32.mrf.mxu0 }
  0xd1   :  { %v202_v45 = vadd.f32 %v201_v36, %v73_v35  ;;  %v225_v48 = vmax.f32 %v207_v40, 0.0 }
  0xd2   :  { %v602_v37 = vpop.f32.mrf.mxu0 }
  0xd3   :  { %v217_v38 = vadd.f32 %v602_v37, %v88_v29  ;;  %v224_v50 = vmax.f32 %v202_v45, 0.0 }
  0xd4   :  { %v211_v39 = vpop.f32.mrf.mxu0 }
  0xd5   :  { %v227_v41 = vmax.f32 %v217_v38, 0.0  ;;  %v212_v42 = vadd.f32 %v211_v39, %v83_v34 }
  0xd7   :  { %v226_v46 = vmax.f32 %v212_v42, 0.0  ;;  %603 = vmatprep.subr.mxu1 %v227_v41 }
  0xd8   :  { %604 = vmatpush3.msra.mxu1 %v227_v41 }
  0xd9   :  { %605 = vmatprep.subr.mxu1 %v226_v46 }
  0xda   :  { %606 = vmatpush3.msra.mxu1 %v226_v46 }
  0xdb   :  { %607 = vmatprep.subr.mxu1 %v225_v48 }
  0xdc   :  { %608 = vmatpush3.msra.mxu1 %v225_v48 }
  0xdd   :  { %609 = vmatprep.subr.mxu1 %v224_v50 }
  0xde   :  { %610 = vmatpush3.msra.mxu1 %v224_v50 }
  0xdf   :  { %611 = vmatprep.subr.mxu1 %v223_v54 }
  0xe0   :  { %612 = vmatpush3.msra.mxu1 %v223_v54 }
  0xe1   :  { %613 = vmatprep.subr.mxu1 %v222_v56 }
  0xe2   :  { %614 = vmatpush3.msra.mxu1 %v222_v56 }
  0xe3   :  { %615 = vmatprep.subr.mxu1 %v221_v57 }
  0xe4   :  { %616 = vmatpush3.msra.mxu1 %v221_v57 }
  0xe5   :  { %617 = vmatprep.subr.mxu1 %v220_v58 }
  0xe6   :  { %618 = vmatpush3.msra.mxu1 %v220_v58 }
  0xe7   :  { %620 = vmatmul.mubr.msk.f32.vlgmr.msra.gmra.mxu1 %vm256_vm1, %v229_v59 }
  0xe8   :  { %622 = vmatprep.mubr.msk.f32.mxu1 %vm256_vm1, %v230_v60 }
  0xeb   :  { %623 = vmatmul.mubr.msk.f32.gmra.mxu1 %vm256_vm1, %v231_v61 }
 0x1a7   :  { %v621_v0 = vpop.f32.mrf.mxu1 }
 0x1a8   :  { %v341_v7 = vadd.f32 %v621_v0, %v244_v5 }
 0x1a9   :  { %v335_v2 = vpop.f32.mrf.mxu1 }
 0x1aa   :  { %v336_v11 = vadd.f32 %v335_v2, %v239_v10  ;;  %v355_v13 = vmax.f32 %v341_v7, 0.0 }
 0x1ab   :  { %v624_v3 = vpop.f32.mrf.mxu1 }
 0x1ac   :  { %v351_v4 = vadd.f32 %v624_v3, %v254_v63  ;;  %v354_v14 = vmax.f32 %v336_v11, 0.0 }
 0x1ad   :  { %v345_v6 = vpop.f32.mrf.mxu1 }
 0x1ae   :  { %v357_v8 = vmax.f32 %v351_v4, 0.0  ;;  %v346_v9 = vadd.f32 %v345_v6, %v249_v1 }
 0x1b0   :  { %v356_v12 = vmax.f32 %v346_v9, 0.0  ;;  %625 = vmatprep.subr.mxu0 %v357_v8 }
 0x1b1   :  { %626 = vmatpush3.msra.mxu0 %v357_v8 }
 0x1b2   :  { %627 = vmatprep.subr.mxu0 %v356_v12 }
 0x1b3   :  { %628 = vmatpush3.msra.mxu0 %v356_v12 }
 0x1b4   :  { %629 = vmatprep.subr.mxu0 %v355_v13 }
 0x1b5   :  { %630 = vmatpush3.msra.mxu0 %v355_v13 }
 0x1b6   :  { %631 = vmatprep.subr.mxu0 %v354_v14 }
 0x1b7   :  { %632 = vmatpush3.msra.mxu0 %v354_v14 }
 0x1b8   :  { %634 = vmatmul.mubr.msk.f32.vlgmr.msra.gmra.mxu0 %vm372_vm2, %v359_v15  ;;  %636 = vmatprep.subr.mxu0 %v649_v16 }
 0x1b9   :  { %640 = vmatprep.mubr.msk.f32.mxu0 %vm650_vm3, %v649_v16 }
 0x278   :  { %v635_v18 = vpop.f32.mrf.mxu0 }
 0x279   :  { %v451_v19 = vadd.f32 %v635_v18, %v370_v17 }
 0x27a   :  { %v445_v21 = vpop.f32.mrf.mxu0 }
 0x27b   :  { %v455_v22 = vmax.f32 %v451_v19, 0.0  ;;  %v446_v23 = vadd.f32 %v445_v21, %v365_v20 }
 0x27d   :  { %v454_v24 = vmax.f32 %v446_v23, 0.0  ;;  %637 = vmatpush3.msra.mxu0 %v455_v22 }
 0x27e   :  { %638 = vmatprep.subr.mxu0 %v649_v16 }
 0x27f   :  { %639 = vmatpush3.msra.mxu0 %v454_v24 }
 0x280   :  { %641 = vmatmul.mubr.msk.f32.vlgmr.msra.gmra.mxu0 %vm90_vm0, %v456_v25 }
 0x340   :  { %v532_v27 = vpop.f32.mrf.mxu0 }
 0x341   :  { %v533_v28 = vadd.f32 %v532_v27, %v461_v26 }
 0x342   :  { %v642_v29 = vpop.f32.mrf.mxu0 }
 0x343   :  { %536 = vst [vmem:[%s824_s9] sm:$0x3] %v533_v28 }

</bundles_post_ra>
